<compile_context>
chip_gen: v7x
topology: tpu7x:2x2x1
jax: 0.10.0
libtpu: 0.0.40
codegen_flags: <defaults>
</compile_context>

<pallas_src>
import functools

import jax
import jax.numpy as jnp
from jax import lax
from jax.experimental import pallas as pl
from jax.experimental.pallas import tpu as pltpu

DT = 1e-3
TAU_SYN_INV = 200.0   # norse LIFParameters / LIParameters default (1 / 5e-3)
TAU_MEM_INV = 100.0   # norse default (1 / 1e-2)
V_TH_ENC = 1.0        # encoder LIF threshold
V_TH_SNN = 0.5        # tutorial LIFRecurrentCell threshold

# constant-folded step coefficients
A_MEM = DT * TAU_MEM_INV             # 0.1  : dv weight on drive term
KEEP_MEM = 1.0 - A_MEM               # 0.9  : membrane leak factor
KEEP_SYN = 1.0 - DT * TAU_SYN_INV    # 0.8  : synaptic-current decay factor


def snn_kernel(x_ref, w_cat_ref, w_out_ref, out_ref, *, seq_length):
    x = x_ref[...]                    # (B, F) constant input current
    w_cat = w_cat_ref[...]            # (F+H, H) bf16, [w_in; w_rec]
    w_out = w_out_ref[...]            # (H, O)   bf16

    B, F = x.shape
    H = w_cat.shape[1]
    O = w_out.shape[1]

    def step(_, carry):
        v_enc, z_s, v_s, i_s, v_li, i_li, vmax = carry

        # ---- encoder: ConstantCurrentLIFEncoder step (lif_current_encoder) ----
        v_enc = v_enc * KEEP_MEM + A_MEM * x
        z_enc = (v_enc > V_TH_ENC).astype(jnp.float32)       # heaviside forward
        v_enc = (1.0 - z_enc) * v_enc                         # reset to v_reset=0

        # ---- SNN layer 1: LIFRecurrentCell step (norse lif_step) ----
        v_dec = v_s * KEEP_MEM + A_MEM * i_s
        i_dec = i_s * KEEP_SYN
        z_new = (v_dec > V_TH_SNN).astype(jnp.float32)
        v_s = (1.0 - z_new) * v_dec                           # v_reset = 0
        # fused input + recurrent matmul: [z_enc | z_s] @ [w_in ; w_rec]
        zz = jnp.concatenate([z_enc, z_s], axis=1).astype(w_cat.dtype)
        i_s = i_dec + jnp.dot(zz, w_cat, preferred_element_type=jnp.float32)
        z_s = z_new

        # ---- fc_out: Linear(H, O, bias=False) ----
        y = jnp.dot(z_new.astype(w_out.dtype), w_out,
                    preferred_element_type=jnp.float32)

        # ---- readout: LICell step (norse li_feed_forward_step) ----
        v_new = v_li * KEEP_MEM + A_MEM * i_li
        i_li = i_li * KEEP_SYN + y
        v_li = v_new

        # ---- decoder part 1: running max over time ----
        vmax = jnp.maximum(vmax, v_new)

        return (v_enc, z_s, v_s, i_s, v_li, i_li, vmax)

    zeros = lambda n: jnp.zeros((B, n), jnp.float32)
    init = (
        zeros(F),                                    # encoder voltage
        zeros(H),                                    # LIF z (spikes)
        zeros(H),                                    # LIF v
        zeros(H),                                    # LIF i
        zeros(O),                                    # LI v
        zeros(O),                                    # LI i
        jnp.full((B, O), -jnp.inf, jnp.float32),     # running max over time
    )

    # T is a small static trip count -> fully unroll for LLO scheduling visibility.
    carry = lax.fori_loop(0, seq_length, step, init, unroll=True)
    vmax = carry[-1]

    # ---- decoder part 2: log_softmax over classes ----
    shifted = vmax - jnp.max(vmax, axis=1, keepdims=True)
    lse = jnp.log(jnp.sum(jnp.exp(shifted), axis=1, keepdims=True))
    out_ref[...] = shifted - lse


def snn_model(x, w_in, w_rec, w_out, seq_length):
    B, F = x.shape
    H = w_in.shape[1]
    O = w_out.shape[1]

    # Fused + narrowed weights (spikes are exactly 0/1, accumulation stays f32).
    w_cat = jnp.concatenate([w_in, w_rec], axis=0).astype(jnp.bfloat16)   # (F+H, H)
    w_out_bf = w_out.astype(jnp.bfloat16)                                 # (H, O)

    vmem = pl.BlockSpec(memory_space=pltpu.MemorySpace.VMEM)

    # Single kernel invocation (no grid): whole recurrence runs in-kernel with
    # register-carried state.  For realistic batch sizes on v7x, a leading
    # "parallel" batch grid axis would let both TensorCores work; at B=2 it is
    # pure overhead, so it is intentionally omitted.
    return pl.pallas_call(
        functools.partial(snn_kernel, seq_length=seq_length),
        out_shape=jax.ShapeDtypeStruct((B, O), jnp.float32),
        in_specs=[vmem, vmem, vmem],
        out_specs=vmem,
    )(x, w_cat, w_out_bf)


if __name__ == "__main__":
    B, F, H, O, T = 2, 32, 32, 10, 8

    key = jax.random.PRNGKey(0)
    k_x, k_in, k_rec, k_out = jax.random.split(key, 4)

    # Constant input currents (scaled so the LIF encoder emits some spikes).
    x = jax.random.uniform(k_x, (B, F), jnp.float32, minval=0.0, maxval=3.0)

    # Deterministic parameter init (norse-style scaling), stored as (in, out).
    w_in = jax.random.normal(k_in, (F, H), jnp.float32) * jnp.sqrt(2.0 / H)
    w_rec = jax.random.normal(k_rec, (H, H), jnp.float32) * jnp.sqrt(2.0 / H)
    w_rec = w_rec * (1.0 - jnp.eye(H, dtype=jnp.float32))   # autapses=False
    bound = 1.0 / jnp.sqrt(H)
    w_out = jax.random.uniform(k_out, (H, O), jnp.float32, minval=-bound, maxval=bound)

    log_p_y = snn_model(x, w_in, w_rec, w_out, seq_length=T)
    log_p_y = jax.block_until_ready(log_p_y)

    assert log_p_y.shape == (B, O)
    assert bool(jnp.all(jnp.isfinite(log_p_y)))
    # log_softmax rows must (approximately) sum to 1 in probability space
    assert bool(jnp.all(jnp.abs(jnp.sum(jnp.exp(log_p_y), axis=1) - 1.0) < 1e-4))
    print("KERNEL_OK")
</pallas_src>

<mosaic_0001>
module attributes {stable_mosaic.version = 11 : i64} {
  func.func @snn_kernel(%arg0: memref<2x32xf32, #tpu.memory_space<vmem>>, %arg1: memref<64x32xbf16, #tpu.memory_space<vmem>>, %arg2: memref<32x10xbf16, #tpu.memory_space<vmem>>, %arg3: memref<2x10xf32, #tpu.memory_space<vmem>>) attributes {dimension_semantics = [], scalar_prefetch = 0 : i64, scratch_operands = 0 : i64, tpu.core_type = #tpu.core_type<tc>} {
    %c0 = arith.constant 0 : index
    %c0_0 = arith.constant 0 : index
    %0 = vector.load %arg0[%c0, %c0_0] : memref<2x32xf32, #tpu.memory_space<vmem>>, vector<2x32xf32>
    %c0_1 = arith.constant 0 : index
    %c0_2 = arith.constant 0 : index
    %1 = vector.load %arg1[%c0_1, %c0_2] : memref<64x32xbf16, #tpu.memory_space<vmem>>, vector<64x32xbf16>
    %c0_3 = arith.constant 0 : index
    %c0_4 = arith.constant 0 : index
    %2 = vector.load %arg2[%c0_3, %c0_4] : memref<32x10xbf16, #tpu.memory_space<vmem>>, vector<32x10xbf16>
    %cst = arith.constant 0.000000e+00 : f32
    %3 = vector.broadcast %cst : f32 to vector<2x32xf32>
    %cst_5 = arith.constant 0.000000e+00 : f32
    %4 = vector.broadcast %cst_5 : f32 to vector<2x32xf32>
    %cst_6 = arith.constant 0.000000e+00 : f32
    %5 = vector.broadcast %cst_6 : f32 to vector<2x32xf32>
    %cst_7 = arith.constant 0.000000e+00 : f32
    %6 = vector.broadcast %cst_7 : f32 to vector<2x32xf32>
    %cst_8 = arith.constant 0.000000e+00 : f32
    %7 = vector.broadcast %cst_8 : f32 to vector<2x10xf32>
    %cst_9 = arith.constant 0.000000e+00 : f32
    %8 = vector.broadcast %cst_9 : f32 to vector<2x10xf32>
    %cst_10 = arith.constant 0xFF800000 : f32
    %9 = vector.broadcast %cst_10 : f32 to vector<2x10xf32>
    %c0_i32 = arith.constant 0 : i32
    %cst_11 = arith.constant 0.899999976 : f32
    %10 = vector.broadcast %cst_11 : f32 to vector<2x32xf32>
    %11 = arith.mulf %3, %10 : vector<2x32xf32>
    %cst_12 = arith.constant 1.000000e-01 : f32
    %12 = vector.broadcast %cst_12 : f32 to vector<2x32xf32>
    %13 = arith.mulf %12, %0 : vector<2x32xf32>
    %14 = arith.addf %11, %13 : vector<2x32xf32>
    %cst_13 = arith.constant 1.000000e+00 : f32
    %15 = vector.broadcast %cst_13 : f32 to vector<2x32xf32>
    %16 = arith.cmpf ogt, %14, %15 : vector<2x32xf32>
    %17 = arith.extui %16 : vector<2x32xi1> to vector<2x32xi32>
    %18 = arith.sitofp %17 : vector<2x32xi32> to vector<2x32xf32>
    %cst_14 = arith.constant 1.000000e+00 : f32
    %19 = vector.broadcast %cst_14 : f32 to vector<2x32xf32>
    %20 = arith.subf %19, %18 : vector<2x32xf32>
    %21 = arith.mulf %20, %14 : vector<2x32xf32>
    %cst_15 = arith.constant 0.899999976 : f32
    %22 = vector.broadcast %cst_15 : f32 to vector<2x32xf32>
    %23 = arith.mulf %5, %22 : vector<2x32xf32>
    %cst_16 = arith.constant 1.000000e-01 : f32
    %24 = vector.broadcast %cst_16 : f32 to vector<2x32xf32>
    %25 = arith.mulf %24, %6 : vector<2x32xf32>
    %26 = arith.addf %23, %25 : vector<2x32xf32>
    %cst_17 = arith.constant 8.000000e-01 : f32
    %27 = vector.broadcast %cst_17 : f32 to vector<2x32xf32>
    %28 = arith.mulf %6, %27 : vector<2x32xf32>
    %cst_18 = arith.constant 5.000000e-01 : f32
    %29 = vector.broadcast %cst_18 : f32 to vector<2x32xf32>
    %30 = arith.cmpf ogt, %26, %29 : vector<2x32xf32>
    %31 = arith.extui %30 : vector<2x32xi1> to vector<2x32xi32>
    %32 = arith.sitofp %31 : vector<2x32xi32> to vector<2x32xf32>
    %cst_19 = arith.constant 1.000000e+00 : f32
    %33 = vector.broadcast %cst_19 : f32 to vector<2x32xf32>
    %34 = arith.subf %33, %32 : vector<2x32xf32>
    %35 = arith.mulf %34, %26 : vector<2x32xf32>
    %36 = tpu.concatenate %18, %4 in 1 : vector<2x32xf32>, vector<2x32xf32> -> vector<2x64xf32>
    %37 = arith.truncf %36 : vector<2x64xf32> to vector<2x64xbf16>
    %cst_20 = arith.constant dense<0.000000e+00> : vector<2x32xf32>
    %38 = tpu.matmul %37, %1, %cst_20 {dimension_numbers = #tpu.dot_dimension_numbers<[1], [0], [0], [1], [0, 0, 1, 1], [], []>} : vector<2x64xbf16>, vector<64x32xbf16>, vector<2x32xf32> -> vector<2x32xf32>
    %39 = arith.addf %28, %38 : vector<2x32xf32>
    %40 = arith.truncf %32 : vector<2x32xf32> to vector<2x32xbf16>
    %cst_21 = arith.constant dense<0.000000e+00> : vector<2x10xf32>
    %41 = tpu.matmul %40, %2, %cst_21 {dimension_numbers = #tpu.dot_dimension_numbers<[1], [0], [0], [1], [0, 0, 1, 1], [], []>} : vector<2x32xbf16>, vector<32x10xbf16>, vector<2x10xf32> -> vector<2x10xf32>
    %cst_22 = arith.constant 0.899999976 : f32
    %42 = vector.broadcast %cst_22 : f32 to vector<2x10xf32>
    %43 = arith.mulf %7, %42 : vector<2x10xf32>
    %cst_23 = arith.constant 1.000000e-01 : f32
    %44 = vector.broadcast %cst_23 : f32 to vector<2x10xf32>
    %45 = arith.mulf %44, %8 : vector<2x10xf32>
    %46 = arith.addf %43, %45 : vector<2x10xf32>
    %cst_24 = arith.constant 8.000000e-01 : f32
    %47 = vector.broadcast %cst_24 : f32 to vector<2x10xf32>
    %48 = arith.mulf %8, %47 : vector<2x10xf32>
    %49 = arith.addf %48, %41 : vector<2x10xf32>
    %50 = arith.maximumf %9, %46 : vector<2x10xf32>
    %c1_i32 = arith.constant 1 : i32
    %cst_25 = arith.constant 0.899999976 : f32
    %51 = vector.broadcast %cst_25 : f32 to vector<2x32xf32>
    %52 = arith.mulf %21, %51 : vector<2x32xf32>
    %cst_26 = arith.constant 1.000000e-01 : f32
    %53 = vector.broadcast %cst_26 : f32 to vector<2x32xf32>
    %54 = arith.mulf %53, %0 : vector<2x32xf32>
    %55 = arith.addf %52, %54 : vector<2x32xf32>
    %cst_27 = arith.constant 1.000000e+00 : f32
    %56 = vector.broadcast %cst_27 : f32 to vector<2x32xf32>
    %57 = arith.cmpf ogt, %55, %56 : vector<2x32xf32>
    %58 = arith.extui %57 : vector<2x32xi1> to vector<2x32xi32>
    %59 = arith.sitofp %58 : vector<2x32xi32> to vector<2x32xf32>
    %cst_28 = arith.constant 1.000000e+00 : f32
    %60 = vector.broadcast %cst_28 : f32 to vector<2x32xf32>
    %61 = arith.subf %60, %59 : vector<2x32xf32>
    %62 = arith.mulf %61, %55 : vector<2x32xf32>
    %cst_29 = arith.constant 0.899999976 : f32
    %63 = vector.broadcast %cst_29 : f32 to vector<2x32xf32>
    %64 = arith.mulf %35, %63 : vector<2x32xf32>
    %cst_30 = arith.constant 1.000000e-01 : f32
    %65 = vector.broadcast %cst_30 : f32 to vector<2x32xf32>
    %66 = arith.mulf %65, %39 : vector<2x32xf32>
    %67 = arith.addf %64, %66 : vector<2x32xf32>
    %cst_31 = arith.constant 8.000000e-01 : f32
    %68 = vector.broadcast %cst_31 : f32 to vector<2x32xf32>
    %69 = arith.mulf %39, %68 : vector<2x32xf32>
    %cst_32 = arith.constant 5.000000e-01 : f32
    %70 = vector.broadcast %cst_32 : f32 to vector<2x32xf32>
    %71 = arith.cmpf ogt, %67, %70 : vector<2x32xf32>
    %72 = arith.extui %71 : vector<2x32xi1> to vector<2x32xi32>
    %73 = arith.sitofp %72 : vector<2x32xi32> to vector<2x32xf32>
    %cst_33 = arith.constant 1.000000e+00 : f32
    %74 = vector.broadcast %cst_33 : f32 to vector<2x32xf32>
    %75 = arith.subf %74, %73 : vector<2x32xf32>
    %76 = arith.mulf %75, %67 : vector<2x32xf32>
    %77 = tpu.concatenate %59, %32 in 1 : vector<2x32xf32>, vector<2x32xf32> -> vector<2x64xf32>
    %78 = arith.truncf %77 : vector<2x64xf32> to vector<2x64xbf16>
    %cst_34 = arith.constant dense<0.000000e+00> : vector<2x32xf32>
    %79 = tpu.matmul %78, %1, %cst_34 {dimension_numbers = #tpu.dot_dimension_numbers<[1], [0], [0], [1], [0, 0, 1, 1], [], []>} : vector<2x64xbf16>, vector<64x32xbf16>, vector<2x32xf32> -> vector<2x32xf32>
    %80 = arith.addf %69, %79 : vector<2x32xf32>
    %81 = arith.truncf %73 : vector<2x32xf32> to vector<2x32xbf16>
    %cst_35 = arith.constant dense<0.000000e+00> : vector<2x10xf32>
    %82 = tpu.matmul %81, %2, %cst_35 {dimension_numbers = #tpu.dot_dimension_numbers<[1], [0], [0], [1], [0, 0, 1, 1], [], []>} : vector<2x32xbf16>, vector<32x10xbf16>, vector<2x10xf32> -> vector<2x10xf32>
    %cst_36 = arith.constant 0.899999976 : f32
    %83 = vector.broadcast %cst_36 : f32 to vector<2x10xf32>
    %84 = arith.mulf %46, %83 : vector<2x10xf32>
    %cst_37 = arith.constant 1.000000e-01 : f32
    %85 = vector.broadcast %cst_37 : f32 to vector<2x10xf32>
    %86 = arith.mulf %85, %49 : vector<2x10xf32>
    %87 = arith.addf %84, %86 : vector<2x10xf32>
    %cst_38 = arith.constant 8.000000e-01 : f32
    %88 = vector.broadcast %cst_38 : f32 to vector<2x10xf32>
    %89 = arith.mulf %49, %88 : vector<2x10xf32>
    %90 = arith.addf %89, %82 : vector<2x10xf32>
    %91 = arith.maximumf %50, %87 : vector<2x10xf32>
    %c2_i32 = arith.constant 2 : i32
    %cst_39 = arith.constant 0.899999976 : f32
    %92 = vector.broadcast %cst_39 : f32 to vector<2x32xf32>
    %93 = arith.mulf %62, %92 : vector<2x32xf32>
    %cst_40 = arith.constant 1.000000e-01 : f32
    %94 = vector.broadcast %cst_40 : f32 to vector<2x32xf32>
    %95 = arith.mulf %94, %0 : vector<2x32xf32>
    %96 = arith.addf %93, %95 : vector<2x32xf32>
    %cst_41 = arith.constant 1.000000e+00 : f32
    %97 = vector.broadcast %cst_41 : f32 to vector<2x32xf32>
    %98 = arith.cmpf ogt, %96, %97 : vector<2x32xf32>
    %99 = arith.extui %98 : vector<2x32xi1> to vector<2x32xi32>
    %100 = arith.sitofp %99 : vector<2x32xi32> to vector<2x32xf32>
    %cst_42 = arith.constant 1.000000e+00 : f32
    %101 = vector.broadcast %cst_42 : f32 to vector<2x32xf32>
    %102 = arith.subf %101, %100 : vector<2x32xf32>
    %103 = arith.mulf %102, %96 : vector<2x32xf32>
    %cst_43 = arith.constant 0.899999976 : f32
    %104 = vector.broadcast %cst_43 : f32 to vector<2x32xf32>
    %105 = arith.mulf %76, %104 : vector<2x32xf32>
    %cst_44 = arith.constant 1.000000e-01 : f32
    %106 = vector.broadcast %cst_44 : f32 to vector<2x32xf32>
    %107 = arith.mulf %106, %80 : vector<2x32xf32>
    %108 = arith.addf %105, %107 : vector<2x32xf32>
    %cst_45 = arith.constant 8.000000e-01 : f32
    %109 = vector.broadcast %cst_45 : f32 to vector<2x32xf32>
    %110 = arith.mulf %80, %109 : vector<2x32xf32>
    %cst_46 = arith.constant 5.000000e-01 : f32
    %111 = vector.broadcast %cst_46 : f32 to vector<2x32xf32>
    %112 = arith.cmpf ogt, %108, %111 : vector<2x32xf32>
    %113 = arith.extui %112 : vector<2x32xi1> to vector<2x32xi32>
    %114 = arith.sitofp %113 : vector<2x32xi32> to vector<2x32xf32>
    %cst_47 = arith.constant 1.000000e+00 : f32
    %115 = vector.broadcast %cst_47 : f32 to vector<2x32xf32>
    %116 = arith.subf %115, %114 : vector<2x32xf32>
    %117 = arith.mulf %116, %108 : vector<2x32xf32>
    %118 = tpu.concatenate %100, %73 in 1 : vector<2x32xf32>, vector<2x32xf32> -> vector<2x64xf32>
    %119 = arith.truncf %118 : vector<2x64xf32> to vector<2x64xbf16>
    %cst_48 = arith.constant dense<0.000000e+00> : vector<2x32xf32>
    %120 = tpu.matmul %119, %1, %cst_48 {dimension_numbers = #tpu.dot_dimension_numbers<[1], [0], [0], [1], [0, 0, 1, 1], [], []>} : vector<2x64xbf16>, vector<64x32xbf16>, vector<2x32xf32> -> vector<2x32xf32>
    %121 = arith.addf %110, %120 : vector<2x32xf32>
    %122 = arith.truncf %114 : vector<2x32xf32> to vector<2x32xbf16>
    %cst_49 = arith.constant dense<0.000000e+00> : vector<2x10xf32>
    %123 = tpu.matmul %122, %2, %cst_49 {dimension_numbers = #tpu.dot_dimension_numbers<[1], [0], [0], [1], [0, 0, 1, 1], [], []>} : vector<2x32xbf16>, vector<32x10xbf16>, vector<2x10xf32> -> vector<2x10xf32>
    %cst_50 = arith.constant 0.899999976 : f32
    %124 = vector.broadcast %cst_50 : f32 to vector<2x10xf32>
    %125 = arith.mulf %87, %124 : vector<2x10xf32>
    %cst_51 = arith.constant 1.000000e-01 : f32
    %126 = vector.broadcast %cst_51 : f32 to vector<2x10xf32>
    %127 = arith.mulf %126, %90 : vector<2x10xf32>
    %128 = arith.addf %125, %127 : vector<2x10xf32>
    %cst_52 = arith.constant 8.000000e-01 : f32
    %129 = vector.broadcast %cst_52 : f32 to vector<2x10xf32>
    %130 = arith.mulf %90, %129 : vector<2x10xf32>
    %131 = arith.addf %130, %123 : vector<2x10xf32>
    %132 = arith.maximumf %91, %128 : vector<2x10xf32>
    %c3_i32 = arith.constant 3 : i32
    %cst_53 = arith.constant 0.899999976 : f32
    %133 = vector.broadcast %cst_53 : f32 to vector<2x32xf32>
    %134 = arith.mulf %103, %133 : vector<2x32xf32>
    %cst_54 = arith.constant 1.000000e-01 : f32
    %135 = vector.broadcast %cst_54 : f32 to vector<2x32xf32>
    %136 = arith.mulf %135, %0 : vector<2x32xf32>
    %137 = arith.addf %134, %136 : vector<2x32xf32>
    %cst_55 = arith.constant 1.000000e+00 : f32
    %138 = vector.broadcast %cst_55 : f32 to vector<2x32xf32>
    %139 = arith.cmpf ogt, %137, %138 : vector<2x32xf32>
    %140 = arith.extui %139 : vector<2x32xi1> to vector<2x32xi32>
    %141 = arith.sitofp %140 : vector<2x32xi32> to vector<2x32xf32>
    %cst_56 = arith.constant 1.000000e+00 : f32
    %142 = vector.broadcast %cst_56 : f32 to vector<2x32xf32>
    %143 = arith.subf %142, %141 : vector<2x32xf32>
    %144 = arith.mulf %143, %137 : vector<2x32xf32>
    %cst_57 = arith.constant 0.899999976 : f32
    %145 = vector.broadcast %cst_57 : f32 to vector<2x32xf32>
    %146 = arith.mulf %117, %145 : vector<2x32xf32>
    %cst_58 = arith.constant 1.000000e-01 : f32
    %147 = vector.broadcast %cst_58 : f32 to vector<2x32xf32>
    %148 = arith.mulf %147, %121 : vector<2x32xf32>
    %149 = arith.addf %146, %148 : vector<2x32xf32>
    %cst_59 = arith.constant 8.000000e-01 : f32
    %150 = vector.broadcast %cst_59 : f32 to vector<2x32xf32>
    %151 = arith.mulf %121, %150 : vector<2x32xf32>
    %cst_60 = arith.constant 5.000000e-01 : f32
    %152 = vector.broadcast %cst_60 : f32 to vector<2x32xf32>
    %153 = arith.cmpf ogt, %149, %152 : vector<2x32xf32>
    %154 = arith.extui %153 : vector<2x32xi1> to vector<2x32xi32>
    %155 = arith.sitofp %154 : vector<2x32xi32> to vector<2x32xf32>
    %cst_61 = arith.constant 1.000000e+00 : f32
    %156 = vector.broadcast %cst_61 : f32 to vector<2x32xf32>
    %157 = arith.subf %156, %155 : vector<2x32xf32>
    %158 = arith.mulf %157, %149 : vector<2x32xf32>
    %159 = tpu.concatenate %141, %114 in 1 : vector<2x32xf32>, vector<2x32xf32> -> vector<2x64xf32>
    %160 = arith.truncf %159 : vector<2x64xf32> to vector<2x64xbf16>
    %cst_62 = arith.constant dense<0.000000e+00> : vector<2x32xf32>
    %161 = tpu.matmul %160, %1, %cst_62 {dimension_numbers = #tpu.dot_dimension_numbers<[1], [0], [0], [1], [0, 0, 1, 1], [], []>} : vector<2x64xbf16>, vector<64x32xbf16>, vector<2x32xf32> -> vector<2x32xf32>
    %162 = arith.addf %151, %161 : vector<2x32xf32>
    %163 = arith.truncf %155 : vector<2x32xf32> to vector<2x32xbf16>
    %cst_63 = arith.constant dense<0.000000e+00> : vector<2x10xf32>
    %164 = tpu.matmul %163, %2, %cst_63 {dimension_numbers = #tpu.dot_dimension_numbers<[1], [0], [0], [1], [0, 0, 1, 1], [], []>} : vector<2x32xbf16>, vector<32x10xbf16>, vector<2x10xf32> -> vector<2x10xf32>
    %cst_64 = arith.constant 0.899999976 : f32
    %165 = vector.broadcast %cst_64 : f32 to vector<2x10xf32>
    %166 = arith.mulf %128, %165 : vector<2x10xf32>
    %cst_65 = arith.constant 1.000000e-01 : f32
    %167 = vector.broadcast %cst_65 : f32 to vector<2x10xf32>
    %168 = arith.mulf %167, %131 : vector<2x10xf32>
    %169 = arith.addf %166, %168 : vector<2x10xf32>
    %cst_66 = arith.constant 8.000000e-01 : f32
    %170 = vector.broadcast %cst_66 : f32 to vector<2x10xf32>
    %171 = arith.mulf %131, %170 : vector<2x10xf32>
    %172 = arith.addf %171, %164 : vector<2x10xf32>
    %173 = arith.maximumf %132, %169 : vector<2x10xf32>
    %c4_i32 = arith.constant 4 : i32
    %cst_67 = arith.constant 0.899999976 : f32
    %174 = vector.broadcast %cst_67 : f32 to vector<2x32xf32>
    %175 = arith.mulf %144, %174 : vector<2x32xf32>
    %cst_68 = arith.constant 1.000000e-01 : f32
    %176 = vector.broadcast %cst_68 : f32 to vector<2x32xf32>
    %177 = arith.mulf %176, %0 : vector<2x32xf32>
    %178 = arith.addf %175, %177 : vector<2x32xf32>
    %cst_69 = arith.constant 1.000000e+00 : f32
    %179 = vector.broadcast %cst_69 : f32 to vector<2x32xf32>
    %180 = arith.cmpf ogt, %178, %179 : vector<2x32xf32>
    %181 = arith.extui %180 : vector<2x32xi1> to vector<2x32xi32>
    %182 = arith.sitofp %181 : vector<2x32xi32> to vector<2x32xf32>
    %cst_70 = arith.constant 1.000000e+00 : f32
    %183 = vector.broadcast %cst_70 : f32 to vector<2x32xf32>
    %184 = arith.subf %183, %182 : vector<2x32xf32>
    %185 = arith.mulf %184, %178 : vector<2x32xf32>
    %cst_71 = arith.constant 0.899999976 : f32
    %186 = vector.broadcast %cst_71 : f32 to vector<2x32xf32>
    %187 = arith.mulf %158, %186 : vector<2x32xf32>
    %cst_72 = arith.constant 1.000000e-01 : f32
    %188 = vector.broadcast %cst_72 : f32 to vector<2x32xf32>
    %189 = arith.mulf %188, %162 : vector<2x32xf32>
    %190 = arith.addf %187, %189 : vector<2x32xf32>
    %cst_73 = arith.constant 8.000000e-01 : f32
    %191 = vector.broadcast %cst_73 : f32 to vector<2x32xf32>
    %192 = arith.mulf %162, %191 : vector<2x32xf32>
    %cst_74 = arith.constant 5.000000e-01 : f32
    %193 = vector.broadcast %cst_74 : f32 to vector<2x32xf32>
    %194 = arith.cmpf ogt, %190, %193 : vector<2x32xf32>
    %195 = arith.extui %194 : vector<2x32xi1> to vector<2x32xi32>
    %196 = arith.sitofp %195 : vector<2x32xi32> to vector<2x32xf32>
    %cst_75 = arith.constant 1.000000e+00 : f32
    %197 = vector.broadcast %cst_75 : f32 to vector<2x32xf32>
    %198 = arith.subf %197, %196 : vector<2x32xf32>
    %199 = arith.mulf %198, %190 : vector<2x32xf32>
    %200 = tpu.concatenate %182, %155 in 1 : vector<2x32xf32>, vector<2x32xf32> -> vector<2x64xf32>
    %201 = arith.truncf %200 : vector<2x64xf32> to vector<2x64xbf16>
    %cst_76 = arith.constant dense<0.000000e+00> : vector<2x32xf32>
    %202 = tpu.matmul %201, %1, %cst_76 {dimension_numbers = #tpu.dot_dimension_numbers<[1], [0], [0], [1], [0, 0, 1, 1], [], []>} : vector<2x64xbf16>, vector<64x32xbf16>, vector<2x32xf32> -> vector<2x32xf32>
    %203 = arith.addf %192, %202 : vector<2x32xf32>
    %204 = arith.truncf %196 : vector<2x32xf32> to vector<2x32xbf16>
    %cst_77 = arith.constant dense<0.000000e+00> : vector<2x10xf32>
    %205 = tpu.matmul %204, %2, %cst_77 {dimension_numbers = #tpu.dot_dimension_numbers<[1], [0], [0], [1], [0, 0, 1, 1], [], []>} : vector<2x32xbf16>, vector<32x10xbf16>, vector<2x10xf32> -> vector<2x10xf32>
    %cst_78 = arith.constant 0.899999976 : f32
    %206 = vector.broadcast %cst_78 : f32 to vector<2x10xf32>
    %207 = arith.mulf %169, %206 : vector<2x10xf32>
    %cst_79 = arith.constant 1.000000e-01 : f32
    %208 = vector.broadcast %cst_79 : f32 to vector<2x10xf32>
    %209 = arith.mulf %208, %172 : vector<2x10xf32>
    %210 = arith.addf %207, %209 : vector<2x10xf32>
    %cst_80 = arith.constant 8.000000e-01 : f32
    %211 = vector.broadcast %cst_80 : f32 to vector<2x10xf32>
    %212 = arith.mulf %172, %211 : vector<2x10xf32>
    %213 = arith.addf %212, %205 : vector<2x10xf32>
    %214 = arith.maximumf %173, %210 : vector<2x10xf32>
    %c5_i32 = arith.constant 5 : i32
    %cst_81 = arith.constant 0.899999976 : f32
    %215 = vector.broadcast %cst_81 : f32 to vector<2x32xf32>
    %216 = arith.mulf %185, %215 : vector<2x32xf32>
    %cst_82 = arith.constant 1.000000e-01 : f32
    %217 = vector.broadcast %cst_82 : f32 to vector<2x32xf32>
    %218 = arith.mulf %217, %0 : vector<2x32xf32>
    %219 = arith.addf %216, %218 : vector<2x32xf32>
    %cst_83 = arith.constant 1.000000e+00 : f32
    %220 = vector.broadcast %cst_83 : f32 to vector<2x32xf32>
    %221 = arith.cmpf ogt, %219, %220 : vector<2x32xf32>
    %222 = arith.extui %221 : vector<2x32xi1> to vector<2x32xi32>
    %223 = arith.sitofp %222 : vector<2x32xi32> to vector<2x32xf32>
    %cst_84 = arith.constant 1.000000e+00 : f32
    %224 = vector.broadcast %cst_84 : f32 to vector<2x32xf32>
    %225 = arith.subf %224, %223 : vector<2x32xf32>
    %226 = arith.mulf %225, %219 : vector<2x32xf32>
    %cst_85 = arith.constant 0.899999976 : f32
    %227 = vector.broadcast %cst_85 : f32 to vector<2x32xf32>
    %228 = arith.mulf %199, %227 : vector<2x32xf32>
    %cst_86 = arith.constant 1.000000e-01 : f32
    %229 = vector.broadcast %cst_86 : f32 to vector<2x32xf32>
    %230 = arith.mulf %229, %203 : vector<2x32xf32>
    %231 = arith.addf %228, %230 : vector<2x32xf32>
    %cst_87 = arith.constant 8.000000e-01 : f32
    %232 = vector.broadcast %cst_87 : f32 to vector<2x32xf32>
    %233 = arith.mulf %203, %232 : vector<2x32xf32>
    %cst_88 = arith.constant 5.000000e-01 : f32
    %234 = vector.broadcast %cst_88 : f32 to vector<2x32xf32>
    %235 = arith.cmpf ogt, %231, %234 : vector<2x32xf32>
    %236 = arith.extui %235 : vector<2x32xi1> to vector<2x32xi32>
    %237 = arith.sitofp %236 : vector<2x32xi32> to vector<2x32xf32>
    %cst_89 = arith.constant 1.000000e+00 : f32
    %238 = vector.broadcast %cst_89 : f32 to vector<2x32xf32>
    %239 = arith.subf %238, %237 : vector<2x32xf32>
    %240 = arith.mulf %239, %231 : vector<2x32xf32>
    %241 = tpu.concatenate %223, %196 in 1 : vector<2x32xf32>, vector<2x32xf32> -> vector<2x64xf32>
    %242 = arith.truncf %241 : vector<2x64xf32> to vector<2x64xbf16>
    %cst_90 = arith.constant dense<0.000000e+00> : vector<2x32xf32>
    %243 = tpu.matmul %242, %1, %cst_90 {dimension_numbers = #tpu.dot_dimension_numbers<[1], [0], [0], [1], [0, 0, 1, 1], [], []>} : vector<2x64xbf16>, vector<64x32xbf16>, vector<2x32xf32> -> vector<2x32xf32>
    %244 = arith.addf %233, %243 : vector<2x32xf32>
    %245 = arith.truncf %237 : vector<2x32xf32> to vector<2x32xbf16>
    %cst_91 = arith.constant dense<0.000000e+00> : vector<2x10xf32>
    %246 = tpu.matmul %245, %2, %cst_91 {dimension_numbers = #tpu.dot_dimension_numbers<[1], [0], [0], [1], [0, 0, 1, 1], [], []>} : vector<2x32xbf16>, vector<32x10xbf16>, vector<2x10xf32> -> vector<2x10xf32>
    %cst_92 = arith.constant 0.899999976 : f32
    %247 = vector.broadcast %cst_92 : f32 to vector<2x10xf32>
    %248 = arith.mulf %210, %247 : vector<2x10xf32>
    %cst_93 = arith.constant 1.000000e-01 : f32
    %249 = vector.broadcast %cst_93 : f32 to vector<2x10xf32>
    %250 = arith.mulf %249, %213 : vector<2x10xf32>
    %251 = arith.addf %248, %250 : vector<2x10xf32>
    %cst_94 = arith.constant 8.000000e-01 : f32
    %252 = vector.broadcast %cst_94 : f32 to vector<2x10xf32>
    %253 = arith.mulf %213, %252 : vector<2x10xf32>
    %254 = arith.addf %253, %246 : vector<2x10xf32>
    %255 = arith.maximumf %214, %251 : vector<2x10xf32>
    %c6_i32 = arith.constant 6 : i32
    %cst_95 = arith.constant 0.899999976 : f32
    %256 = vector.broadcast %cst_95 : f32 to vector<2x32xf32>
    %257 = arith.mulf %226, %256 : vector<2x32xf32>
    %cst_96 = arith.constant 1.000000e-01 : f32
    %258 = vector.broadcast %cst_96 : f32 to vector<2x32xf32>
    %259 = arith.mulf %258, %0 : vector<2x32xf32>
    %260 = arith.addf %257, %259 : vector<2x32xf32>
    %cst_97 = arith.constant 1.000000e+00 : f32
    %261 = vector.broadcast %cst_97 : f32 to vector<2x32xf32>
    %262 = arith.cmpf ogt, %260, %261 : vector<2x32xf32>
    %263 = arith.extui %262 : vector<2x32xi1> to vector<2x32xi32>
    %264 = arith.sitofp %263 : vector<2x32xi32> to vector<2x32xf32>
    %cst_98 = arith.constant 1.000000e+00 : f32
    %265 = vector.broadcast %cst_98 : f32 to vector<2x32xf32>
    %266 = arith.subf %265, %264 : vector<2x32xf32>
    %267 = arith.mulf %266, %260 : vector<2x32xf32>
    %cst_99 = arith.constant 0.899999976 : f32
    %268 = vector.broadcast %cst_99 : f32 to vector<2x32xf32>
    %269 = arith.mulf %240, %268 : vector<2x32xf32>
    %cst_100 = arith.constant 1.000000e-01 : f32
    %270 = vector.broadcast %cst_100 : f32 to vector<2x32xf32>
    %271 = arith.mulf %270, %244 : vector<2x32xf32>
    %272 = arith.addf %269, %271 : vector<2x32xf32>
    %cst_101 = arith.constant 8.000000e-01 : f32
    %273 = vector.broadcast %cst_101 : f32 to vector<2x32xf32>
    %274 = arith.mulf %244, %273 : vector<2x32xf32>
    %cst_102 = arith.constant 5.000000e-01 : f32
    %275 = vector.broadcast %cst_102 : f32 to vector<2x32xf32>
    %276 = arith.cmpf ogt, %272, %275 : vector<2x32xf32>
    %277 = arith.extui %276 : vector<2x32xi1> to vector<2x32xi32>
    %278 = arith.sitofp %277 : vector<2x32xi32> to vector<2x32xf32>
    %cst_103 = arith.constant 1.000000e+00 : f32
    %279 = vector.broadcast %cst_103 : f32 to vector<2x32xf32>
    %280 = arith.subf %279, %278 : vector<2x32xf32>
    %281 = arith.mulf %280, %272 : vector<2x32xf32>
    %282 = tpu.concatenate %264, %237 in 1 : vector<2x32xf32>, vector<2x32xf32> -> vector<2x64xf32>
    %283 = arith.truncf %282 : vector<2x64xf32> to vector<2x64xbf16>
    %cst_104 = arith.constant dense<0.000000e+00> : vector<2x32xf32>
    %284 = tpu.matmul %283, %1, %cst_104 {dimension_numbers = #tpu.dot_dimension_numbers<[1], [0], [0], [1], [0, 0, 1, 1], [], []>} : vector<2x64xbf16>, vector<64x32xbf16>, vector<2x32xf32> -> vector<2x32xf32>
    %285 = arith.addf %274, %284 : vector<2x32xf32>
    %286 = arith.truncf %278 : vector<2x32xf32> to vector<2x32xbf16>
    %cst_105 = arith.constant dense<0.000000e+00> : vector<2x10xf32>
    %287 = tpu.matmul %286, %2, %cst_105 {dimension_numbers = #tpu.dot_dimension_numbers<[1], [0], [0], [1], [0, 0, 1, 1], [], []>} : vector<2x32xbf16>, vector<32x10xbf16>, vector<2x10xf32> -> vector<2x10xf32>
    %cst_106 = arith.constant 0.899999976 : f32
    %288 = vector.broadcast %cst_106 : f32 to vector<2x10xf32>
    %289 = arith.mulf %251, %288 : vector<2x10xf32>
    %cst_107 = arith.constant 1.000000e-01 : f32
    %290 = vector.broadcast %cst_107 : f32 to vector<2x10xf32>
    %291 = arith.mulf %290, %254 : vector<2x10xf32>
    %292 = arith.addf %289, %291 : vector<2x10xf32>
    %cst_108 = arith.constant 8.000000e-01 : f32
    %293 = vector.broadcast %cst_108 : f32 to vector<2x10xf32>
    %294 = arith.mulf %254, %293 : vector<2x10xf32>
    %295 = arith.addf %294, %287 : vector<2x10xf32>
    %296 = arith.maximumf %255, %292 : vector<2x10xf32>
    %c7_i32 = arith.constant 7 : i32
    %cst_109 = arith.constant 0.899999976 : f32
    %297 = vector.broadcast %cst_109 : f32 to vector<2x32xf32>
    %298 = arith.mulf %267, %297 : vector<2x32xf32>
    %cst_110 = arith.constant 1.000000e-01 : f32
    %299 = vector.broadcast %cst_110 : f32 to vector<2x32xf32>
    %300 = arith.mulf %299, %0 : vector<2x32xf32>
    %301 = arith.addf %298, %300 : vector<2x32xf32>
    %cst_111 = arith.constant 1.000000e+00 : f32
    %302 = vector.broadcast %cst_111 : f32 to vector<2x32xf32>
    %303 = arith.cmpf ogt, %301, %302 : vector<2x32xf32>
    %304 = arith.extui %303 : vector<2x32xi1> to vector<2x32xi32>
    %305 = arith.sitofp %304 : vector<2x32xi32> to vector<2x32xf32>
    %cst_112 = arith.constant 1.000000e+00 : f32
    %306 = vector.broadcast %cst_112 : f32 to vector<2x32xf32>
    %307 = arith.subf %306, %305 : vector<2x32xf32>
    %308 = arith.mulf %307, %301 : vector<2x32xf32>
    %cst_113 = arith.constant 0.899999976 : f32
    %309 = vector.broadcast %cst_113 : f32 to vector<2x32xf32>
    %310 = arith.mulf %281, %309 : vector<2x32xf32>
    %cst_114 = arith.constant 1.000000e-01 : f32
    %311 = vector.broadcast %cst_114 : f32 to vector<2x32xf32>
    %312 = arith.mulf %311, %285 : vector<2x32xf32>
    %313 = arith.addf %310, %312 : vector<2x32xf32>
    %cst_115 = arith.constant 8.000000e-01 : f32
    %314 = vector.broadcast %cst_115 : f32 to vector<2x32xf32>
    %315 = arith.mulf %285, %314 : vector<2x32xf32>
    %cst_116 = arith.constant 5.000000e-01 : f32
    %316 = vector.broadcast %cst_116 : f32 to vector<2x32xf32>
    %317 = arith.cmpf ogt, %313, %316 : vector<2x32xf32>
    %318 = arith.extui %317 : vector<2x32xi1> to vector<2x32xi32>
    %319 = arith.sitofp %318 : vector<2x32xi32> to vector<2x32xf32>
    %cst_117 = arith.constant 1.000000e+00 : f32
    %320 = vector.broadcast %cst_117 : f32 to vector<2x32xf32>
    %321 = arith.subf %320, %319 : vector<2x32xf32>
    %322 = arith.mulf %321, %313 : vector<2x32xf32>
    %323 = tpu.concatenate %305, %278 in 1 : vector<2x32xf32>, vector<2x32xf32> -> vector<2x64xf32>
    %324 = arith.truncf %323 : vector<2x64xf32> to vector<2x64xbf16>
    %cst_118 = arith.constant dense<0.000000e+00> : vector<2x32xf32>
    %325 = tpu.matmul %324, %1, %cst_118 {dimension_numbers = #tpu.dot_dimension_numbers<[1], [0], [0], [1], [0, 0, 1, 1], [], []>} : vector<2x64xbf16>, vector<64x32xbf16>, vector<2x32xf32> -> vector<2x32xf32>
    %326 = arith.addf %315, %325 : vector<2x32xf32>
    %327 = arith.truncf %319 : vector<2x32xf32> to vector<2x32xbf16>
    %cst_119 = arith.constant dense<0.000000e+00> : vector<2x10xf32>
    %328 = tpu.matmul %327, %2, %cst_119 {dimension_numbers = #tpu.dot_dimension_numbers<[1], [0], [0], [1], [0, 0, 1, 1], [], []>} : vector<2x32xbf16>, vector<32x10xbf16>, vector<2x10xf32> -> vector<2x10xf32>
    %cst_120 = arith.constant 0.899999976 : f32
    %329 = vector.broadcast %cst_120 : f32 to vector<2x10xf32>
    %330 = arith.mulf %292, %329 : vector<2x10xf32>
    %cst_121 = arith.constant 1.000000e-01 : f32
    %331 = vector.broadcast %cst_121 : f32 to vector<2x10xf32>
    %332 = arith.mulf %331, %295 : vector<2x10xf32>
    %333 = arith.addf %330, %332 : vector<2x10xf32>
    %cst_122 = arith.constant 8.000000e-01 : f32
    %334 = vector.broadcast %cst_122 : f32 to vector<2x10xf32>
    %335 = arith.mulf %295, %334 : vector<2x10xf32>
    %336 = arith.addf %335, %328 : vector<2x10xf32>
    %337 = arith.maximumf %296, %333 : vector<2x10xf32>
    %cst_123 = arith.constant dense<0xFF800000> : vector<2xf32>
    %338 = vector.multi_reduction <maximumf>, %337, %cst_123 [1] : vector<2x10xf32> to vector<2xf32>
    %339 = vector.shape_cast %338 : vector<2xf32> to vector<2x1xf32>
    %340 = vector.broadcast %339 : vector<2x1xf32> to vector<2x10xf32>
    %341 = arith.subf %337, %340 : vector<2x10xf32>
    %342 = math.exp %341 : vector<2x10xf32>
    %cst_124 = arith.constant dense<0.000000e+00> : vector<2xf32>
    %343 = vector.multi_reduction <add>, %342, %cst_124 [1] : vector<2x10xf32> to vector<2xf32>
    %344 = vector.shape_cast %343 : vector<2xf32> to vector<2x1xf32>
    %345 = math.log %344 : vector<2x1xf32>
    %346 = vector.broadcast %345 : vector<2x1xf32> to vector<2x10xf32>
    %347 = arith.subf %341, %346 : vector<2x10xf32>
    %c0_125 = arith.constant 0 : index
    %c0_126 = arith.constant 0 : index
    %348 = vector.load %arg3[%c0_125, %c0_126] : memref<2x10xf32, #tpu.memory_space<vmem>>, vector<2x10xf32>
    tpu.vector_store %arg3[%c0_125, %c0_126], %347 {strides = array<i32>} : memref<2x10xf32, #tpu.memory_space<vmem>>, vector<2x10xf32>,
    return
  }
}

</mosaic_0001>

<bundles_post_ra>
// kernel: tpu_custom_call.1
= control target key start
LH: loop header
LB: loop body
LE: loop exit
PB: predicated region body
PF: predicated region fallthrough
CT: control target
= control target key end

     0   :  { %v1077_v1 = vmov 0.0   ;;  %vm1078_vm0 = vmmov 0   ;;  %s1340_s0 = inlined_call_operand.vmem [shape: f32[2,32], index: 0, kind: input, shape index: {}]   ;;  %s1341_s1 = inlined_call_operand.vmem [shape: bf16[64,32], index: 1, kind: input, shape index: {}]   ;;  %s1342_s2 = inlined_call_operand.vmem [shape: bf16[32,10], index: 2, kind: input, shape index: {}]   ;;  %s1343_s3 = inlined_call_operand.hbm [shape: f32[2,10], index: 3, kind: output, shape index: {}]  }
   0x1   :  { %v1105_v0 = vld [vmem:[%s1341_s1] sm:$0xff]   ;;  %910 = vmatprep.subr.bf16.mxu0 %v1077_v1  ;;  %922 = vmatprep.subr.bf16.mxu1 %v1077_v1  ;;  %v1118_v3 = vld [vmem:[%s1341_s1 + $0x8] sm:$0xff]   ;;  %v1136_v5 = vld [vmem:[%s1341_s1 + $0x10] sm:$0xff]  }
   0x2   :  { %v1112_v2 = vld [vmem:[%s1342_s2] sm:$0xff]   ;;  %911 = vmatpush3.bf16.msra.mxu0 %v1105_v0  ;;  %926 = vmatprep.mubr.msk.bf16.mxu1 %vm1078_vm0, %v1077_v1  ;;  %v1127_v4 = vld [vmem:[%s1342_s2 + $0x8] sm:$0xff]  }
   0x3   :  { %923 = vmatpush3.bf16.msra.mxu1 %v1112_v2  ;;  %912 = vmatprep.subr.bf16.mxu0 %v1077_v1  ;;  %v16_v6 = vld [vmem:[%s1340_s0] sm:$0x3] }
   0x4   :  { %924 = vmatprep.subr.bf16.mxu1 %v1077_v1  ;;  %918 = vmatprep.mubr.msk.bf16.mxu0 %vm1078_vm0, %v1077_v1 }
   0x6   :  { %913 = vmatpush3.bf16.msra.mxu0 %v1118_v3 }
   0x7   :  { %8 = vsyncpa [#allocation3], 0  ;;  %925 = vmatpush3.bf16.msra.mxu1 %v1127_v4  ;;  %914 = vmatprep.subr.bf16.mxu0 %v1077_v1  ;;  %v1143_v7 = vmul.f32 0.1, %v16_v6  ;;  %vm41_vm1 = vcmask 261120   ;;  %v1079_v8 = vmov 0.0|0.0  }
   0x8   :  { %930 = vmatprep.subr.bf16.mxu1 %v1077_v1  ;;  %v1151_v9 = vld [vmem:[%s1341_s1 + $0x18] sm:$0xff]   ;;  %vm68_vm3 = vcmask 523264   ;;  %s1080_s0 = smov 32   ;;  %vm801_vm15 = vcmask 74752   ;;  %s1081_s1 = smov [#allocation2]  }
   0x9   :  { %vm31_vm2 = vcmp.gt.f32.partialorder %v1143_v7, 1.0  ;;  %s821_s25 = sshll.u32 %s1081_s1, 4  ;;  %s822_s25 = int_to_ptr.vmem [resolvable:$true] %s821_s25 }
   0xa   :  { %927 = vmatmul.mubr.bf16.vlgmr.msra.gmra.mrb[0].mxu1 %v1079_v8  ;;  %915 = vmatpush3.bf16.msra.mxu0 %v1136_v5  ;;  %v829_v10 = vsel %vm31_vm2, 1.0, %v1077_v1  ;;  %s1053_s26 = scalar_lea.vmem %s822_s25, 32  ;;  %p1058_p1 = scmp.lt.s32.totalorder %s822_s25, %s822_s25 }
   0xb   :  { %931 = vmatpush3.bf16.msra.mxu1 %v1105_v0  ;;  %916 = vmatprep.subr.bf16.mxu0 %v1077_v1  ;;  %v34_v11 = vsub.f32 1.0, %v829_v10  ;;  %v42_v12 = vsel %vm41_vm1, %v829_v10, 0.0  ;;  %p1054_p0 = scmp.ne.s32.totalorder %s822_s25, %s1053_s26  ;;  %p1059_p2 = scmp.lt.s32.totalorder %s1053_s26, %s1053_s26 }
   0xc   :  { %932 = vmatprep.subr.bf16.mxu1 %v1077_v1  ;;  %938 = vmatprep.mubr.msk.bf16.mxu1 %vm1078_vm0, %v1077_v1  ;;  %v43_v14 = vpack.c.bf16 %v42_v12, %v42_v12 }
   0xd   :  { %v35_v13 = vmul.f32 %v34_v11, %v1143_v7  ;;  %p1060_p3 = por %p1059_p2, %p1058_p1 }
   0xe   :  { %917 = vmatpush3.bf16.msra.mxu0 %v1151_v9 }
   0xf   :  { %933 = vmatpush3.bf16.msra.mxu1 %v1118_v3  ;;  %v168_v15 = vmul.f32 0.9, %v35_v13  ;;  %942 = vmatprep.subr.bf16.mxu0 %v1077_v1  ;;  %p1061_p4 = pnand %p1060_p3, %p1054_p0 }
  0x10   :  { %934 = vmatprep.subr.bf16.mxu1 %v1077_v1 }
  0x11   :  { %919 = vmatmul.mubr.msk.bf16.vlgmr.msra.gmra.mrb[0].mxu0 %vm68_vm3, %v43_v14  ;;  %v1167_v16 = vadd.f32 %v168_v15, %v1143_v7 }
  0x12   :  { %943 = vmatpush3.bf16.msra.mxu0 %v1112_v2  ;;  %946 = vmatprep.mubr.msk.bf16.mxu0 %vm1078_vm0, %v1077_v1 }
  0x13   :  { %935 = vmatpush3.bf16.msra.mxu1 %v1136_v5  ;;  %vm170_vm4 = vcmp.gt.f32.partialorder %v1167_v16, 1.0  ;;  %944 = vmatprep.subr.bf16.mxu0 %v1077_v1 }
  0x14   :  { %936 = vmatprep.subr.bf16.mxu1 %v1077_v1  ;;  %v1177_v17 = vsel %vm170_vm4, 1.0, %v1077_v1 }
  0x15   :  { %v184_v18 = vsel %vm41_vm1, %v1177_v17, 0.0  ;;  %v173_v46 = vsub.f32 1.0, %v1177_v17 }
  0x16   :  { %v185_v19 = vpack.c.bf16 %v184_v18, %v184_v18  ;;  %945 = vmatpush3.bf16.msra.mxu0 %v1127_v4 }
  0x17   :  { %937 = vmatpush3.bf16.msra.mxu1 %v1151_v9  ;;  %950 = vmatprep.subr.bf16.mxu0 %v1077_v1  ;;  %v174_v47 = vmul.f32 %v173_v46, %v1167_v16 }
  0x18   :  { %962 = vmatprep.subr.bf16.mxu1 %v1077_v1 }
  0x19   :  { %v279_v48 = vmul.f32 0.9, %v174_v47 }
  0x1a   :  { %939 = vmatmul.mubr.msk.bf16.vlgmr.msra.gmra.mrb[4].mxu1 %vm68_vm3, %v185_v19 }
  0x1b   :  { %963 = vmatpush3.bf16.msra.mxu1 %v1112_v2  ;;  %966 = vmatprep.mubr.msk.bf16.mxu1 %vm1078_vm0, %v1077_v1  ;;  %v280_v49 = vadd.f32 %v279_v48, %v1143_v7 }
  0x1c   :  { %964 = vmatprep.subr.bf16.mxu1 %v1077_v1 }
  0x1d   :  { %vm281_vm7 = vcmp.gt.f32.partialorder %v280_v49, 1.0 }
  0x1e   :  { %v841_v50 = vsel %vm281_vm7, 1.0, %v1077_v1 }
  0x1f   :  { %965 = vmatpush3.bf16.msra.mxu1 %v1127_v4  ;;  %v284_v51 = vsub.f32 1.0, %v841_v50 }
  0x20   :  { %970 = vmatprep.subr.bf16.mxu1 %v1077_v1 }
  0x21   :  { %v285_v52 = vmul.f32 %v284_v51, %v280_v49 }
  0x23   :  { %v395_v54 = vmul.f32 0.9, %v285_v52 }
  0x25   :  { %v1232_v57 = vadd.f32 %v395_v54, %v1143_v7 }
  0x27   :  { %vm397_vm8 = vcmp.gt.f32.partialorder %v1232_v57, 1.0 }
  0x28   :  { %v1242_v58 = vsel %vm397_vm8, 1.0, %v1077_v1 }
  0x29   :  { %v400_v54 = vsub.f32 1.0, %v1242_v58 }
  0xdd   :  { %v1192_v20 = vpop.f32.mrb[0].mxu1 }
  0xde   :  { %v928_v21 = vpop.f32.mrb[1].mxu1  ;;  %v274_v62 = vmul.f32 0.1, %v1192_v20  ;;  %v276_v63 = vmul.f32 0.8, %v1192_v20 }
  0xdf   :  { %v165_v22 = vpop.f32.mrb[2].mxu1 }
  0xe0   :  { %v929_v23 = vpop.f32.mrb[3].mxu1  ;;  %v389_v12 = vmul.f32 0.9, %v274_v62  ;;  %v278_v15 = vmax.f32 %v274_v62, 0.0 }
  0xe4   :  { %v106_v24 = vpop.f32.mrb[0].mxu0 }
  0xe5   :  { %v176_v25 = vmul.f32 0.1, %v106_v24  ;;  %v920_v26 = vpop.f32.mrb[1].mxu0  ;;  %v178_v32 = vmul.f32 0.8, %v106_v24 }
  0xe6   :  { %v109_v27 = vpop.f32.mrb[2].mxu0 }
  0xe7   :  { %v921_v28 = vpop.f32.mrb[3].mxu0  ;;  %vm179_vm5 = vcmp.gt.f32.partialorder %v176_v25, 0.5 }
  0xe8   :  { %v838_v29 = vsel %vm179_vm5, 1.0, %v1077_v1 }
  0xe9   :  { %296 = vrot.lane.b32.xlu0 %v838_v29, %s1080_s0  ;;  %v182_v30 = vsub.f32 1.0, %v838_v29  ;;  %v230_v31 = vpack.c.bf16 %v838_v29, %v838_v29 }
  0xeb   :  { %947 = vmatmul.mubr.msk.bf16.vlgmr.msra.gmra.mrb[4].mxu0 %vm41_vm1, %v230_v31  ;;  %v183_v33 = vmul.f32 %v182_v30, %v176_v25 }
  0xec   :  { %951 = vmatpush3.bf16.msra.mxu0 %v1105_v0  ;;  %958 = vmatprep.mubr.msk.bf16.mxu0 %vm1078_vm0, %v1077_v1 }
  0xed   :  { %v223_v34 = vpop.f32.mrb[4].mxu1  ;;  %952 = vmatprep.subr.bf16.mxu0 %v1077_v1  ;;  %v286_v38 = vmul.f32 0.9, %v183_v33 }
  0xee   :  { %v1201_v35 = vadd.f32 %v223_v34, %v178_v32  ;;  %v940_v36 = vpop.f32.mrb[5].mxu1 }
  0xef   :  { %v226_v37 = vpop.f32.mrb[6].mxu1 }
  0xf0   :  { %v287_v39 = vmul.f32 0.1, %v1201_v35  ;;  %v941_v40 = vpop.f32.mrb[7].mxu1  ;;  %953 = vmatpush3.bf16.msra.mxu0 %v1118_v3  ;;  %v289_v28 = vmul.f32 0.8, %v1201_v35 }
  0xf1   :  { %954 = vmatprep.subr.bf16.mxu0 %v1077_v1 }
  0xf2   :  { %v288_v41 = vadd.f32 %v287_v39, %v286_v38 }
  0xf4   :  { %vm290_vm6 = vcmp.gt.f32.partialorder %v288_v41, 0.5  ;;  %955 = vmatpush3.bf16.msra.mxu0 %v1136_v5 }
  0xf5   :  { %v842_v42 = vsel %vm290_vm6, 1.0, %v1077_v1  ;;  %956 = vmatprep.subr.bf16.mxu0 %v1077_v1 }
  0xf6   :  { %412 = vrot.lane.b32.xlu0 %v842_v42, %s1080_s0  ;;  %v293_v43 = vsub.f32 1.0, %v842_v42  ;;  %v345_v44 = vpack.c.bf16 %v842_v42, %v842_v42 }
  0xf8   :  { %v1210_v45 = vmul.f32 %v293_v43, %v288_v41  ;;  %967 = vmatmul.mubr.msk.bf16.vlgmr.msra.gmra.mrb[8].mxu1 %vm41_vm1, %v345_v44  ;;  %957 = vmatpush3.bf16.msra.mxu0 %v1151_v9 }
  0xf9   :  { %971 = vmatpush3.bf16.msra.mxu1 %v1105_v0  ;;  %978 = vmatprep.mubr.msk.bf16.mxu1 %vm1078_vm0, %v1077_v1 }
  0xfa   :  { %972 = vmatprep.subr.bf16.mxu1 %v1077_v1  ;;  %982 = vmatprep.subr.bf16.mxu0 %v1077_v1  ;;  %v402_v33 = vmul.f32 0.9, %v1210_v45 }
  0xfd   :  { %973 = vmatpush3.bf16.msra.mxu1 %v1118_v3 }
  0xfe   :  { %974 = vmatprep.subr.bf16.mxu1 %v1077_v1 }
 0x101   :  { %975 = vmatpush3.bf16.msra.mxu1 %v1136_v5 }
 0x102   :  { %976 = vmatprep.subr.bf16.mxu1 %v1077_v1 }
 0x105   :  { %977 = vmatpush3.bf16.msra.mxu1 %v1151_v9 }
 0x106   :  { %1002 = vmatprep.subr.bf16.mxu1 %v1077_v1 }
 0x15b   :  { %v297_v53 = vpop.permute.xlu0 %296 }
 0x15c   :  { %v299_v55 = vsel %vm41_vm1, %v841_v50, %v297_v53 }
 0x15d   :  { %v300_v56 = vpack.c.bf16 %v299_v55, %v299_v55 }
 0x15f   :  { %959 = vmatmul.mubr.msk.bf16.vlgmr.msra.gmra.mrb[8].mxu0 %vm68_vm3, %v300_v56 }
 0x160   :  { %983 = vmatpush3.bf16.msra.mxu0 %v1112_v2  ;;  %986 = vmatprep.mubr.msk.bf16.mxu0 %vm1078_vm0, %v1077_v1 }
 0x161   :  { %984 = vmatprep.subr.bf16.mxu0 %v1077_v1 }
 0x164   :  { %985 = vmatpush3.bf16.msra.mxu0 %v1127_v4 }
 0x165   :  { %990 = vmatprep.subr.bf16.mxu0 %v1077_v1 }
 0x168   :  { %v413_v59 = vpop.permute.xlu0 %412 }
 0x169   :  { %v415_v60 = vsel %vm41_vm1, %v1242_v58, %v413_v59 }
 0x16a   :  { %v416_v61 = vpack.c.bf16 %v415_v60, %v415_v60 }
 0x16c   :  { %979 = vmatmul.mubr.msk.bf16.vlgmr.msra.gmra.mrb[12].mxu1 %vm68_vm3, %v416_v61 }
 0x16d   :  { %1003 = vmatpush3.bf16.msra.mxu1 %v1112_v2  ;;  %1006 = vmatprep.mubr.msk.bf16.mxu1 %vm1078_vm0, %v1077_v1 }
 0x16e   :  { %1004 = vmatprep.subr.bf16.mxu1 %v1077_v1 }
 0x171   :  { %1005 = vmatpush3.bf16.msra.mxu1 %v1127_v4 }
 0x172   :  { %1010 = vmatprep.subr.bf16.mxu1 %v1077_v1 }
 0x1be   :  { %v268_v6 = vpop.f32.mrb[4].mxu0 }
 0x1bf   :  { %v277_v8 = vadd.f32 %v276_v63, %v268_v6  ;;  %v948_v10 = vpop.f32.mrb[5].mxu0 }
 0x1c0   :  { %v271_v11 = vpop.f32.mrb[6].mxu0 }
 0x1c1   :  { %v390_v13 = vmul.f32 0.1, %v277_v8  ;;  %v949_v14 = vpop.f32.mrb[7].mxu0  ;;  %v392_v18 = vmul.f32 0.8, %v277_v8 }
 0x1c3   :  { %v391_v16 = vadd.f32 %v390_v13, %v389_v12 }
 0x1c5   :  { %v1255_v17 = vmax.f32 %v278_v15, %v391_v16  ;;  %v505_v24 = vmul.f32 0.9, %v391_v16 }
 0x1cb   :  { %v383_v19 = vpop.f32.mrb[8].mxu1 }
 0x1cc   :  { %v1257_v21 = vadd.f32 %v392_v18, %v383_v19  ;;  %v968_v22 = vpop.f32.mrb[9].mxu1 }
 0x1cd   :  { %v386_v23 = vpop.f32.mrb[10].mxu1 }
 0x1ce   :  { %v506_v20 = vmul.f32 0.1, %v1257_v21  ;;  %v969_v25 = vpop.f32.mrb[11].mxu1 }
 0x1d0   :  { %v1260_v26 = vadd.f32 %v506_v20, %v505_v24 }
 0x1d2   :  { %v510_v27 = vmax.f32 %v1255_v17, %v1260_v26  ;;  %v621_v14 = vmul.f32 0.9, %v1260_v26 }
 0x232   :  { %v338_v29 = vpop.f32.mrb[8].mxu0 }
 0x233   :  { %v344_v30 = vadd.f32 %v338_v29, %v289_v28  ;;  %v960_v31 = vpop.f32.mrb[9].mxu0 }
 0x234   :  { %v341_v32 = vpop.f32.mrb[10].mxu0 }
 0x235   :  { %v403_v34 = vmul.f32 0.1, %v344_v30  ;;  %v961_v36 = vpop.f32.mrb[11].mxu0  ;;  %v405_v35 = vmul.f32 0.8, %v344_v30 }
 0x237   :  { %v404_v37 = vadd.f32 %v403_v34, %v402_v33 }
 0x239   :  { %vm406_vm9 = vcmp.gt.f32.partialorder %v404_v37, 0.5 }
 0x23a   :  { %v846_v38 = vsel %vm406_vm9, 1.0, %v1077_v1 }
 0x23b   :  { %528 = vrot.lane.b32.xlu1 %v846_v38, %s1080_s0  ;;  %v409_v39 = vsub.f32 1.0, %v846_v38  ;;  %v461_v40 = vpack.c.bf16 %v846_v38, %v846_v38 }
 0x23d   :  { %987 = vmatmul.mubr.msk.bf16.vlgmr.msra.gmra.mrb[12].mxu0 %vm41_vm1, %v461_v40  ;;  %v410_v41 = vmul.f32 %v409_v39, %v404_v37 }
 0x23e   :  { %991 = vmatpush3.bf16.msra.mxu0 %v1105_v0  ;;  %998 = vmatprep.mubr.msk.bf16.mxu0 %vm1078_vm0, %v1077_v1 }
 0x23f   :  { %v454_v42 = vpop.f32.mrb[12].mxu1  ;;  %992 = vmatprep.subr.bf16.mxu0 %v1077_v1  ;;  %v518_v46 = vmul.f32 0.9, %v410_v41 }
 0x240   :  { %v1273_v43 = vadd.f32 %v454_v42, %v405_v35  ;;  %v980_v44 = vpop.f32.mrb[13].mxu1 }
 0x241   :  { %v457_v45 = vpop.f32.mrb[14].mxu1 }
 0x242   :  { %v519_v47 = vmul.f32 0.1, %v1273_v43  ;;  %v981_v48 = vpop.f32.mrb[15].mxu1  ;;  %993 = vmatpush3.bf16.msra.mxu0 %v1118_v3  ;;  %v521_v32 = vmul.f32 0.8, %v1273_v43 }
 0x243   :  { %994 = vmatprep.subr.bf16.mxu0 %v1077_v1 }
 0x244   :  { %v520_v49 = vadd.f32 %v519_v47, %v518_v46 }
 0x246   :  { %vm522_vm10 = vcmp.gt.f32.partialorder %v520_v49, 0.5  ;;  %995 = vmatpush3.bf16.msra.mxu0 %v1136_v5 }
 0x247   :  { %v850_v50 = vsel %vm522_vm10, 1.0, %v1077_v1  ;;  %996 = vmatprep.subr.bf16.mxu0 %v1077_v1 }
 0x248   :  { %642 = vrot.lane.b32.xlu1 %v850_v50, %s1080_s0  ;;  %v525_v51 = vsub.f32 1.0, %v850_v50  ;;  %v577_v52 = vpack.c.bf16 %v850_v50, %v850_v50 }
 0x24a   :  { %v526_v53 = vmul.f32 %v525_v51, %v520_v49  ;;  %1007 = vmatmul.mubr.msk.bf16.vlgmr.msra.gmra.mrb[16].mxu1 %vm41_vm1, %v577_v52  ;;  %997 = vmatpush3.bf16.msra.mxu0 %v1151_v9 }
 0x24b   :  { %1011 = vmatpush3.bf16.msra.mxu1 %v1105_v0  ;;  %1018 = vmatprep.mubr.msk.bf16.mxu1 %vm1078_vm0, %v1077_v1  ;;  %v401_v0 = vmul.f32 %v400_v54, %v1232_v57 }
 0x24c   :  { %1012 = vmatprep.subr.bf16.mxu1 %v1077_v1  ;;  %1022 = vmatprep.subr.bf16.mxu0 %v1077_v1  ;;  %v632_v38 = vmul.f32 0.9, %v526_v53 }
 0x24d   :  { %v511_v55 = vmul.f32 0.9, %v401_v0 }
 0x24f   :  { %1013 = vmatpush3.bf16.msra.mxu1 %v1118_v3  ;;  %v512_v56 = vadd.f32 %v511_v55, %v1143_v7 }
 0x250   :  { %1014 = vmatprep.subr.bf16.mxu1 %v1077_v1 }
 0x251   :  { %vm513_vm11 = vcmp.gt.f32.partialorder %v512_v56, 1.0 }
 0x252   :  { %v849_v59 = vsel %vm513_vm11, 1.0, %v1077_v1 }
 0x253   :  { %1015 = vmatpush3.bf16.msra.mxu1 %v1136_v5  ;;  %v516_v60 = vsub.f32 1.0, %v849_v59 }
 0x254   :  { %1016 = vmatprep.subr.bf16.mxu1 %v1077_v1 }
 0x255   :  { %v517_v3 = vmul.f32 %v516_v60, %v512_v56 }
 0x257   :  { %1017 = vmatpush3.bf16.msra.mxu1 %v1151_v9  ;;  %v627_v62 = vmul.f32 0.9, %v517_v3 }
 0x259   :  { %v628_v9 = vadd.f32 %v627_v62, %v1143_v7  ;;  %v508_v7 = vmul.f32 0.8, %v1257_v21 }
 0x25b   :  { %vm629_vm12 = vcmp.gt.f32.partialorder %v628_v9, 1.0 }
 0x25c   :  { %v853_v57 = vsel %vm629_vm12, 1.0, %v1077_v1 }
 0x2ad   :  { %v529_v61 = vpop.permute.xlu1 %528 }
 0x2ae   :  { %v531_v5 = vsel %vm41_vm1, %v849_v59, %v529_v61 }
 0x2af   :  { %v532_v63 = vpack.c.bf16 %v531_v5, %v531_v5 }
 0x2b1   :  { %999 = vmatmul.mubr.msk.bf16.vlgmr.msra.gmra.mrb[16].mxu0 %vm68_vm3, %v532_v63 }
 0x2b2   :  { %1023 = vmatpush3.bf16.msra.mxu0 %v1112_v2  ;;  %1026 = vmatprep.mubr.msk.bf16.mxu0 %vm1078_vm0, %v1077_v1 }
 0x2b3   :  { %1024 = vmatprep.subr.bf16.mxu0 %v1077_v1 }
 0x2b6   :  { %1025 = vmatpush3.bf16.msra.mxu0 %v1127_v4 }
 0x2b7   :  { %1030 = vmatprep.subr.bf16.mxu0 %v1077_v1 }
 0x2ba   :  { %v643_v58 = vpop.permute.xlu1 %642 }
 0x2bb   :  { %v645_v6 = vsel %vm41_vm1, %v853_v57, %v643_v58 }
 0x2bc   :  { %v646_v8 = vpack.c.bf16 %v645_v6, %v645_v6 }
 0x2be   :  { %1019 = vmatmul.mubr.msk.bf16.vlgmr.msra.gmra.mrb[20].mxu1 %vm68_vm3, %v646_v8 }
 0x310   :  { %v499_v10 = vpop.f32.mrb[12].mxu0 }
 0x311   :  { %v509_v11 = vadd.f32 %v508_v7, %v499_v10  ;;  %v988_v12 = vpop.f32.mrb[13].mxu0 }
 0x312   :  { %v502_v13 = vpop.f32.mrb[14].mxu0 }
 0x313   :  { %v622_v15 = vmul.f32 0.1, %v509_v11  ;;  %v989_v16 = vpop.f32.mrb[15].mxu0  ;;  %v624_v22 = vmul.f32 0.8, %v509_v11 }
 0x315   :  { %v623_v18 = vadd.f32 %v622_v15, %v621_v14 }
 0x317   :  { %v626_v19 = vmax.f32 %v510_v27, %v623_v18  ;;  %v735_v28 = vmul.f32 0.9, %v623_v18 }
 0x31d   :  { %v615_v23 = vpop.f32.mrb[16].mxu1 }
 0x31e   :  { %v625_v24 = vadd.f32 %v624_v22, %v615_v23  ;;  %v1008_v20 = vpop.f32.mrb[17].mxu1 }
 0x31f   :  { %v618_v25 = vpop.f32.mrb[18].mxu1 }
 0x320   :  { %v736_v21 = vmul.f32 0.1, %v625_v24  ;;  %v1009_v29 = vpop.f32.mrb[19].mxu1 }
 0x322   :  { %v737_v30 = vadd.f32 %v736_v21, %v735_v28 }
 0x324   :  { %v740_v31 = vmax.f32 %v626_v19, %v737_v30  ;;  %v791_v56 = vmul.f32 0.9, %v737_v30 }
 0x384   :  { %v570_v33 = vpop.f32.mrb[16].mxu0 }
 0x385   :  { %v576_v34 = vadd.f32 %v570_v33, %v521_v32  ;;  %v1000_v36 = vpop.f32.mrb[17].mxu0 }
 0x386   :  { %v573_v37 = vpop.f32.mrb[18].mxu0 }
 0x387   :  { %v633_v39 = vmul.f32 0.1, %v576_v34  ;;  %v1001_v17 = vpop.f32.mrb[19].mxu0  ;;  %v635_v35 = vmul.f32 0.8, %v576_v34 }
 0x389   :  { %v634_v26 = vadd.f32 %v633_v39, %v632_v38 }
 0x38b   :  { %vm636_vm13 = vcmp.gt.f32.partialorder %v634_v26, 0.5 }
 0x38c   :  { %v854_v27 = vsel %vm636_vm13, 1.0, %v1077_v1 }
 0x38d   :  { %v691_v40 = vpack.c.bf16 %v854_v27, %v854_v27  ;;  %v639_v41 = vsub.f32 1.0, %v854_v27 }
 0x38f   :  { %1027 = vmatmul.mubr.msk.bf16.vlgmr.msra.gmra.mrb[20].mxu0 %vm41_vm1, %v691_v40  ;;  %v640_v42 = vmul.f32 %v639_v41, %v634_v26 }
 0x390   :  { %1031 = vmatpush3.bf16.msra.mxu0 %v1112_v2  ;;  %1034 = vmatprep.mubr.msk.bf16.mxu0 %vm1078_vm0, %v1077_v1  ;;  %v738_v2 = vmul.f32 0.8, %v625_v24 }
 0x391   :  { %v684_v43 = vpop.f32.mrb[20].mxu1  ;;  %1032 = vmatprep.subr.bf16.mxu0 %v1077_v1  ;;  %v741_v47 = vmul.f32 0.9, %v640_v42 }
 0x392   :  { %v690_v44 = vadd.f32 %v684_v43, %v635_v35  ;;  %v1020_v45 = vpop.f32.mrb[21].mxu1 }
 0x393   :  { %v687_v46 = vpop.f32.mrb[22].mxu1 }
 0x394   :  { %v742_v48 = vmul.f32 0.1, %v690_v44  ;;  %v1021_v49 = vpop.f32.mrb[23].mxu1  ;;  %1033 = vmatpush3.bf16.msra.mxu0 %v1127_v4 }
 0x396   :  { %v743_v50 = vadd.f32 %v742_v48, %v741_v47 }
 0x398   :  { %vm744_vm14 = vcmp.gt.f32.partialorder %v743_v50, 0.5 }
 0x399   :  { %v857_v51 = vsel %vm744_vm14, 1.0, %v1077_v1 }
 0x39a   :  { %v747_v52 = vpack.c.bf16 %v857_v51, %v857_v51 }
 0x39c   :  { %1035 = vmatmul.mubr.msk.bf16.vlgmr.msra.gmra.mrb[24].mxu0 %vm41_vm1, %v747_v52 }
 0x462   :  { %v729_v53 = vpop.f32.mrb[20].mxu0 }
 0x463   :  { %v739_v54 = vadd.f32 %v738_v2, %v729_v53  ;;  %v1028_v0 = vpop.f32.mrb[21].mxu0 }
 0x464   :  { %v732_v55 = vpop.f32.mrb[22].mxu0 }
 0x465   :  { %v792_v59 = vmul.f32 0.1, %v739_v54  ;;  %v1029_v60 = vpop.f32.mrb[23].mxu0  ;;  %v794_v62 = vmul.f32 0.8, %v739_v54 }
 0x467   :  { %v793_v3 = vadd.f32 %v792_v59, %v791_v56 }
 0x469   :  { %v796_v61 = vmax.f32 %v740_v31, %v793_v3  ;;  %v797_v57 = vmul.f32 0.9, %v793_v3 }
 0x46f   :  { %v785_v5 = vpop.f32.mrb[24].mxu0 }
 0x470   :  { %v795_v4 = vadd.f32 %v794_v62, %v785_v5  ;;  %v1036_v63 = vpop.f32.mrb[25].mxu0 }
 0x471   :  { %v788_v9 = vpop.f32.mrb[26].mxu0 }
 0x472   :  { %v798_v1 = vmul.f32 0.1, %v795_v4  ;;  %v1037_v58 = vpop.f32.mrb[27].mxu0 }
 0x474   :  { %v799_v6 = vadd.f32 %v798_v1, %v797_v57 }
 0x476   :  { %v800_v8 = vmax.f32 %v796_v61, %v799_v6 }
 0x478   :  { %v802_v7 = vsel %vm801_vm15, %v800_v8, -inf }
 0x479   :  { %803 = vmax.xlane.f32.xlu0 %v802_v7 }
 0x506   :  { %v804_v10 = vpop.xlane.xlu0 %803 }
 0x507   :  { %v805_v11 = vsub.f32 %v800_v8, %v804_v10 }
 0x509   :  { %v806_v12 = vmul.f32 1.442695, %v805_v11 }
 0x50b   :  { %1049 = vpow2.f32 %v806_v12 }
 0x515   :  { %v1050_v13 = vpop.eup %1049 }
 0x516   :  { %v808_v14 = vsel %vm801_vm15, %v1050_v13, 0.0 }
 0x517   :  { %809 = vadd.xlane.f32.xlu1 %v808_v14 }
 0x5a4   :  { %v810_v15 = vpop.xlane.xlu1 %809 }
 0x5a5   :  { %1051 = vlog2.f32 %v810_v15 }
 0x5af   :  { %v1052_v16 = vpop.eup %1051 }
 0x5b0   :  { %v812_v18 = vmul.f32 0.6931472, %v1052_v16 }
 0x5b2   :  { %v813_v19 = vsub.f32 %v805_v11, %v812_v18 }
 0x5b4   :  { %814 = vst.msk [vmem:[#allocation2] sm:$0x3] %vm801_vm15, %v813_v19 }
 0x5b5   :  { %1064 = shalt.err (!%p1061_p4)
}
 0x5b6   :  { %s1065_s29 = scalar_lea.hbm %s1343_s3, 32 }
 0x5b7   :  { %p1066_p5 = scmp.ne.s32.totalorder %s1343_s3, %s1065_s29  ;;  %p1069_p6 = scmp.lt.u32.totalorder %s1065_s29, %s1343_s3 }
 0x5b9   :  { %p1071_p7 = pnand %p1069_p6, %p1066_p5 }
 0x5bb   :  { %1074 = shalt.err (!%p1071_p7)
}
 0x5bc   :  { %824 = dma.vmem_to_hbm [thread:$0]  %s822_s25, 32, %s1343_s3, [#allocation3]  }
 0x5bd   :  { %1075 = dma.done.wait [#allocation3], 32  }
 0x5be   :  { %1076 = vsyncadd [#allocation3], 4294967264 }
 0x5bf   :  { %828 = vsyncpa [#allocation3], 1 }

</bundles_post_ra>
